<compile_context>
chip_gen: v7x
topology: tpu7x:2x2x1
jax: 0.10.0
libtpu: 0.0.40
codegen_flags: <defaults>
</compile_context>

<pallas_src>
import numpy as np
import jax
import jax.numpy as jnp
from jax.experimental import pallas as pl
from jax.experimental.pallas import tpu as pltpu


# ----------------------------------------------------------------------------
# Pose-chain (4x4) helpers -- pure XLA.
# A (1,4,4) Pallas block is 64 B; per-grid-step + custom-call overhead is
# 100-1000x the compute, so the rigid-transform chain stays in XLA where the
# whole chain fuses into a handful of vector ops.
# ----------------------------------------------------------------------------

def safe_inverse(T):
    """Rigid-transform inverse: [[R,t],[0,1]] -> [[R^T,-R^T t],[0,1]]. T: (...,4,4)."""
    R = T[..., :3, :3]
    t = T[..., :3, 3]
    Rt = jnp.swapaxes(R, -1, -2)
    tinv = -jnp.einsum('...ij,...j->...i', Rt, t)
    top = jnp.concatenate([Rt, tinv[..., None]], axis=-1)
    bottom = jnp.broadcast_to(
        jnp.array([0.0, 0.0, 0.0, 1.0], jnp.float32), T.shape[:-2] + (1, 4))
    return jnp.concatenate([top, bottom], axis=-2)


def pack_seqdim(x, B):
    return x.reshape((B * x.shape[1],) + x.shape[2:])


def unpack_seqdim(x, B):
    return x.reshape((B, x.shape[0] // B) + x.shape[1:])


def get_camM_T_camXs(origin_T_camXs, ind=0):
    """camM_T_camXs[:, s] = inv(origin_T_camXs[:, ind]) @ origin_T_camXs[:, s]."""
    camM_T_origin = safe_inverse(origin_T_camXs[:, ind])                  # (B,4,4)
    return jnp.einsum('bij,bsjk->bsik', camM_T_origin, origin_T_camXs)    # (B,S,4,4)


# ----------------------------------------------------------------------------
# Pallas kernel 1: fused 3-way apply_4x4 (lane-dense layout)
#   - one launch for the whole batch grid (grid over B*S only),
#   - xyz read once, three transformed point clouds written,
#   - points live on the 128-wide lane axis -> unmasked vector loads/stores,
#   - VPU broadcast multiply-adds (no MXU), translation added in-kernel.
# ----------------------------------------------------------------------------

def _fused_apply4x4_kernel(t_ref, xyz_ref, oR_ref, oX0_ref, oR0_ref):
    # t_ref:   (1, 3, 4, 4)  three rigid transforms for this batch element
    # xyz_ref: (1, 3, N)     point cloud, coords on sublanes, points on lanes
    # o*_ref:  (1, 3, N)
    p = xyz_ref[...]
    x = p[:, 0:1, :]                                # (1, 1, N) lane-dense
    y = p[:, 1:2, :]
    z = p[:, 2:3, :]
    t = t_ref[...]                                  # (1, 3, 4, 4)
    outs = (oR_ref, oX0_ref, oR0_ref)
    for k in range(3):
        o_ref = outs[k]
        for i in range(3):
            a = t[:, k, i:i + 1, 0:1]               # (1,1,1) broadcast over N
            b = t[:, k, i:i + 1, 1:2]
            c = t[:, k, i:i + 1, 2:3]
            d = t[:, k, i:i + 1, 3:4]               # translation (homogeneous term)
            o_ref[:, i:i + 1, :] = a * x + b * y + c * z + d


def apply_4x4_fused(Ts, xyz):
    """Apply three 4x4 rigid transforms to one point cloud in a single launch.

    Ts: (BS, 3, 4, 4) f32, xyz: (BS, N, 3) f32 -> 3 x (BS, N, 3) f32.
    """
    bs, n, _ = xyz.shape
    xyz_t = jnp.swapaxes(xyz, 1, 2).astype(jnp.float32)      # (BS, 3, N) lane-dense
    pts_spec = pl.BlockSpec((1, 3, n), lambda b: (b, 0, 0))
    outs = pl.pallas_call(
        _fused_apply4x4_kernel,
        out_shape=tuple(jax.ShapeDtypeStruct((bs, 3, n), jnp.float32)
                        for _ in range(3)),
        grid=(bs,),
        in_specs=[pl.BlockSpec((1, 3, 4, 4), lambda b: (b, 0, 0, 0)), pts_spec],
        out_specs=(pts_spec, pts_spec, pts_spec),
        compiler_params=pltpu.CompilerParams(
            dimension_semantics=("parallel",)),
    )(Ts.astype(jnp.float32), xyz_t)
    return tuple(jnp.swapaxes(o, 1, 2) for o in outs)        # back to (BS, N, 3)


# ----------------------------------------------------------------------------
# Pallas kernel 2: free-space dilation
#   run_train:  free = 1 - conv3d(1 - free, ones(1,1,3,3,3), padding=1).clamp(0,1)
#   implemented as a separable 3x3x3 box sum (6 adds instead of 26), with
#   in-VMEM zero padding.  Two variants:
#     - no-halo fast path when the whole Z extent is a single tile,
#     - z-tiled path with 1-row halos above/below for large volumes.
# ----------------------------------------------------------------------------

def _dilate3d_kernel_nohalo(f_ref, o_ref, pad_ref):
    # f_ref: (1, Z, Y, X); o_ref: (1, Z, Y, X); pad_ref: VMEM (Z+2, Y+2, X+2) f32
    _, z, y, x = o_ref.shape
    pad_ref[...] = jnp.zeros_like(pad_ref)
    pad_ref[1:z + 1, 1:y + 1, 1:x + 1] = 1.0 - f_ref[0].astype(jnp.float32)

    xp = pad_ref[...]                                              # (Z+2,Y+2,X+2)
    sx = xp[:, :, 0:x] + xp[:, :, 1:x + 1] + xp[:, :, 2:x + 2]     # (Z+2,Y+2,X)
    sy = sx[:, 0:y, :] + sx[:, 1:y + 1, :] + sx[:, 2:y + 2, :]     # (Z+2,Y,  X)
    sz = sy[0:z, :, :] + sy[1:z + 1, :, :] + sy[2:z + 2, :, :]     # (Z,  Y,  X)

    o_ref[...] = (1.0 - jnp.clip(sz, 0.0, 1.0))[None].astype(o_ref.dtype)


def _dilate3d_kernel_halo(f_ref, lo_ref, hi_ref, o_ref, pad_ref):
    # f_ref:  (1, TZ, Y, X)  current z-tile of `free`
    # lo_ref: (1, 1,  Y, X)  row just above the tile (masked when zi == 0)
    # hi_ref: (1, 1,  Y, X)  row just below the tile (masked when zi == nz-1)
    # o_ref:  (1, TZ, Y, X)
    # pad_ref: VMEM scratch (TZ+2, Y+2, X+2) f32 -- in-kernel zero padding
    zi = pl.program_id(1)
    nz = pl.num_programs(1)
    _, tz, y, x = o_ref.shape

    pad_ref[...] = jnp.zeros_like(pad_ref)
    pad_ref[1:tz + 1, 1:y + 1, 1:x + 1] = 1.0 - f_ref[0].astype(jnp.float32)
    lo_valid = (zi > 0).astype(jnp.float32)
    hi_valid = (zi < nz - 1).astype(jnp.float32)
    pad_ref[0:1, 1:y + 1, 1:x + 1] = \
        lo_valid * (1.0 - lo_ref[0].astype(jnp.float32))
    pad_ref[tz + 1:tz + 2, 1:y + 1, 1:x + 1] = \
        hi_valid * (1.0 - hi_ref[0].astype(jnp.float32))

    xp = pad_ref[...]                                              # (TZ+2,Y+2,X+2)
    sx = xp[:, :, 0:x] + xp[:, :, 1:x + 1] + xp[:, :, 2:x + 2]     # (TZ+2,Y+2,X)
    sy = sx[:, 0:y, :] + sx[:, 1:y + 1, :] + sx[:, 2:y + 2, :]     # (TZ+2,Y,  X)
    sz = sy[0:tz, :, :] + sy[1:tz + 1, :, :] + sy[2:tz + 2, :, :]  # (TZ,  Y,  X)

    o_ref[...] = (1.0 - jnp.clip(sz, 0.0, 1.0))[None].astype(o_ref.dtype)


def _pick_ztile(z, y, x, itemsize, vmem_budget_bytes=32 * 1024 * 1024):
    """Largest divisor of Z whose double-buffered tiles + scratch fit the budget."""
    best = 1
    for d in range(1, z + 1):
        if z % d != 0:
            continue
        tile_bytes = (2 * 2 * d * y * x + 2 * 2 * y * x) * itemsize   # in+out (+halo), x2 buf
        scratch_bytes = (d + 2) * (y + 2) * (x + 2) * 4
        if tile_bytes + scratch_bytes <= vmem_budget_bytes:
            best = d
    return best


def dilate_free(free, tz=None):
    """free: (B, 1, Z, Y, X) -> same shape.  1 - clamp(conv3d(1-free, ones(3,3,3), pad=1), 0, 1)."""
    b, c, z, y, x = free.shape
    assert c == 1
    f = free.reshape(b, z, y, x)
    if tz is None:
        tz = _pick_ztile(z, y, x, np.dtype(f.dtype).itemsize)
    assert z % tz == 0, "z-tile must divide Z"
    nz = z // tz
    zmax = z - 1

    cparams = pltpu.CompilerParams(
        dimension_semantics=("parallel",) * (1 if nz == 1 else 2),
        # raise the scoped VMEM limit (default 16/32 MiB) while staying
        # safely under v7x's 64 MiB physical VMEM
        vmem_limit_bytes=48 * 1024 * 1024)

    if nz == 1:
        # Whole Z extent in one tile: no halo inputs, no boundary masking.
        out = pl.pallas_call(
            _dilate3d_kernel_nohalo,
            out_shape=jax.ShapeDtypeStruct((b, z, y, x), f.dtype),
            grid=(b,),
            in_specs=[pl.BlockSpec((1, z, y, x), lambda bi: (bi, 0, 0, 0))],
            out_specs=pl.BlockSpec((1, z, y, x), lambda bi: (bi, 0, 0, 0)),
            scratch_shapes=[pltpu.VMEM((z + 2, y + 2, x + 2), jnp.float32)],
            compiler_params=cparams,
        )(f)
    else:
        out = pl.pallas_call(
            _dilate3d_kernel_halo,
            out_shape=jax.ShapeDtypeStruct((b, z, y, x), f.dtype),
            grid=(b, nz),
            in_specs=[
                # main z-tile
                pl.BlockSpec((1, tz, y, x), lambda bi, zi: (bi, zi, 0, 0)),
                # one-row halos above / below (clamped at the boundary; masked in-kernel)
                pl.BlockSpec((1, 1, y, x),
                             lambda bi, zi: (bi, jnp.maximum(zi * tz - 1, 0), 0, 0)),
                pl.BlockSpec((1, 1, y, x),
                             lambda bi, zi: (bi, jnp.minimum(zi * tz + tz, zmax), 0, 0)),
            ],
            out_specs=pl.BlockSpec((1, tz, y, x), lambda bi, zi: (bi, zi, 0, 0)),
            scratch_shapes=[pltpu.VMEM((tz + 2, y + 2, x + 2), jnp.float32)],
            compiler_params=cparams,
        )(f, f, f)
    return out.reshape(b, 1, z, y, x)


# ----------------------------------------------------------------------------
# Model
# ----------------------------------------------------------------------------

class LescroartMocModel:
    def __init__(self):
        self.crop = (18, 18, 18)
        # run_train dilation weights (torch.ones(1,1,3,3,3)) -- baked as ones.
        self.conv3d_weights = jnp.ones((1, 1, 3, 3, 3), jnp.float32)
        # TODO(synk): Feat3dNet / OccNet / Emb3dNet / ViewNet / MiDaS submodules
        # are external to this file and are not replicated.

    def prepare_common_tensors(self, feed):
        B = feed['set_batch_size']
        S = feed['set_seqlen']
        self.B, self.S = B, S
        __p = lambda t: pack_seqdim(t, B)
        __u = lambda t: unpack_seqdim(t, B)

        self.rgb_camXs = feed['rgb_camXs'].astype(jnp.float32)
        self.pix_T_cams = feed['pix_T_cams'].astype(jnp.float32)
        self.origin_T_camRs = feed['origin_T_camRs'].astype(jnp.float32)
        self.origin_T_camXs = feed['origin_T_camXs'].astype(jnp.float32)

        # ---- pose chain: tiny 4x4 algebra, fused by XLA ----
        self.camX0s_T_camXs = get_camM_T_camXs(self.origin_T_camXs, ind=0)
        self.camR0s_T_camRs = get_camM_T_camXs(self.origin_T_camRs, ind=0)
        self.camRs_T_camR0 = safe_inverse(self.camR0s_T_camRs)
        self.camRs_T_camXs = jnp.matmul(safe_inverse(self.origin_T_camRs),
                                        self.origin_T_camXs)
        self.camXs_T_camRs = safe_inverse(self.camRs_T_camXs)
        self.camXs_T_camX0s = safe_inverse(self.camX0s_T_camXs)
        self.camX0_T_camR0 = jnp.matmul(self.camX0s_T_camXs[:, 0],
                                        self.camXs_T_camRs[:, 0])
        self.camR0s_T_camXs = jnp.matmul(self.camR0s_T_camRs, self.camRs_T_camXs)

        self.H = self.rgb_camXs.shape[-2]
        self.W = self.rgb_camXs.shape[-1]

        # ---- fused point transforms: one Pallas launch, xyz read once ----
        # xyz_camR0s = camR0s_T_camRs @ (camRs_T_camXs @ xyz) == camR0s_T_camXs @ xyz
        self.xyz_camXs = feed['xyz_camXs'].astype(jnp.float32)
        Ts = jnp.stack([__p(self.camRs_T_camXs),
                        __p(self.camX0s_T_camXs),
                        __p(self.camR0s_T_camXs)], axis=1)          # (B*S, 3, 4, 4)
        xyz_p = __p(self.xyz_camXs)                                  # (B*S, N, 3)
        xyz_camRs_p, xyz_camX0s_p, xyz_camR0s_p = apply_4x4_fused(Ts, xyz_p)
        self.xyz_camRs = __u(xyz_camRs_p)
        self.xyz_camX0s = __u(xyz_camX0s_p)
        self.xyz_camR0s = __u(xyz_camR0s_p)

        # TODO(synk): create_depth_image, Vox_util voxelization / inbound masks and
        # summ_writer logging depend on utils.vox / utils.improc and are omitted.
        return True

    def run_train(self, feed):
        results = {}
        total_loss = jnp.float32(0.0)

        # TODO(synk): Feat3dNet / OccNet / Emb3dNet / ViewNet forward passes and
        # their losses require the external subnetwork definitions.

        # hyp.do_occ branch: free-space dilation (defined inline in the module).
        free_halfmemX0_sup = feed['free_halfmemX0_sup'].astype(jnp.float32)
        free_halfmemX0_sup = dilate_free(free_halfmemX0_sup)

        results['free_halfmemX0_sup'] = free_halfmemX0_sup
        results['xyz_camRs'] = self.xyz_camRs
        results['xyz_camX0s'] = self.xyz_camX0s
        results['xyz_camR0s'] = self.xyz_camR0s
        results['camR0s_T_camXs'] = self.camR0s_T_camXs
        results['camX0_T_camR0'] = self.camX0_T_camR0
        return total_loss, results, False

    def forward(self, feed):
        set_name = feed['set_name']
        ok = self.prepare_common_tensors(feed)
        if ok:
            if set_name == 'train' or set_name == 'val':
                return self.run_train(feed)
            return False
        return jnp.float32(0.0), None, False


# ----------------------------------------------------------------------------
# Deterministic synthetic inputs + reference checks
# ----------------------------------------------------------------------------

def make_rigid(key, B, S):
    k1, k2 = jax.random.split(key)
    ang = jax.random.uniform(k1, (B, S, 3), minval=-0.5, maxval=0.5)
    trans = jax.random.uniform(k2, (B, S, 3), minval=-1.0, maxval=1.0)
    cx, sx = jnp.cos(ang[..., 0]), jnp.sin(ang[..., 0])
    cy, sy = jnp.cos(ang[..., 1]), jnp.sin(ang[..., 1])
    cz, sz = jnp.cos(ang[..., 2]), jnp.sin(ang[..., 2])
    z = jnp.zeros_like(cx)
    o = jnp.ones_like(cx)
    Rx = jnp.stack([o, z, z, z, cx, -sx, z, sx, cx], -1).reshape(B, S, 3, 3)
    Ry = jnp.stack([cy, z, sy, z, o, z, -sy, z, cy], -1).reshape(B, S, 3, 3)
    Rz = jnp.stack([cz, -sz, z, sz, cz, z, z, z, o], -1).reshape(B, S, 3, 3)
    R = Rz @ Ry @ Rx
    top = jnp.concatenate([R, trans[..., None]], -1)
    bottom = jnp.broadcast_to(jnp.array([0., 0., 0., 1.], jnp.float32), (B, S, 1, 4))
    return jnp.concatenate([top, bottom], -2).astype(jnp.float32)


def apply_4x4_ref(T, xyz):
    xyz1 = jnp.concatenate([xyz, jnp.ones(xyz.shape[:-1] + (1,), xyz.dtype)], -1)
    return jnp.einsum('bij,bnj->bni', T, xyz1)[..., :3]


def dilate_free_ref(free):
    inv = 1.0 - free[:, 0]
    z, y, x = inv.shape[1:]
    invp = jnp.pad(inv, ((0, 0), (1, 1), (1, 1), (1, 1)))
    acc = sum(invp[:, dz:dz + z, dy:dy + y, dx:dx + x]
              for dz in range(3) for dy in range(3) for dx in range(3))
    return (1.0 - jnp.clip(acc, 0.0, 1.0))[:, None]


if __name__ == "__main__":
    key = jax.random.PRNGKey(0)
    B, S, H, W, N = 2, 2, 16, 16, 128
    Z4 = Y4 = X4 = 8
    ks = jax.random.split(key, 6)

    rgb_camXs = jax.random.uniform(ks[0], (B, S, 3, H, W), jnp.float32)
    fx = fy = float(W) / 2.0
    Kmat = jnp.array([[fx, 0., W / 2., 0.],
                      [0., fy, H / 2., 0.],
                      [0., 0., 1., 0.],
                      [0., 0., 0., 1.]], jnp.float32)
    pix_T_cams = jnp.broadcast_to(Kmat, (B, S, 4, 4))
    origin_T_camRs = make_rigid(ks[1], B, S)
    origin_T_camXs = make_rigid(ks[2], B, S)
    xyz_camXs = jax.random.uniform(ks[3], (B, S, N, 3), jnp.float32, -2.0, 2.0)
    free_sup = (jax.random.uniform(ks[4], (B, 1, Z4, Y4, X4)) > 0.5).astype(jnp.float32)

    feed = {
        'set_name': 'train',
        'set_batch_size': B,
        'set_seqlen': S,
        'global_step': 0,
        'rgb_camXs': rgb_camXs,
        'pix_T_cams': pix_T_cams,
        'origin_T_camRs': origin_T_camRs,
        'origin_T_camXs': origin_T_camXs,
        'xyz_camXs': xyz_camXs,
        'free_halfmemX0_sup': free_sup,
    }

    model = LescroartMocModel()
    total_loss, results, _ = model.forward(feed)
    jax.block_until_ready((total_loss, results))

    # ---- correctness checks against plain-JAX references ----
    ref_camRs_T_camXs = jnp.matmul(safe_inverse(origin_T_camRs), origin_T_camXs)
    ref_camX0s_T_camXs = get_camM_T_camXs(origin_T_camXs, ind=0)
    ref_camR0s_T_camRs = get_camM_T_camXs(origin_T_camRs, ind=0)

    xyz_pk = pack_seqdim(xyz_camXs, B)
    ref_Rs = apply_4x4_ref(pack_seqdim(ref_camRs_T_camXs, B), xyz_pk)
    ref_X0s = apply_4x4_ref(pack_seqdim(ref_camX0s_T_camXs, B), xyz_pk)
    ref_R0s = apply_4x4_ref(pack_seqdim(ref_camR0s_T_camRs, B), ref_Rs)

    assert jnp.allclose(pack_seqdim(results['xyz_camRs'], B), ref_Rs,
                        atol=1e-4, rtol=1e-4)
    assert jnp.allclose(pack_seqdim(results['xyz_camX0s'], B), ref_X0s,
                        atol=1e-4, rtol=1e-4)
    assert jnp.allclose(pack_seqdim(results['xyz_camR0s'], B), ref_R0s,
                        atol=1e-4, rtol=1e-4)

    ref_free = dilate_free_ref(free_sup)
    # Default path: whole Z in one tile -> no-halo fast path.
    assert jnp.allclose(results['free_halfmemX0_sup'], ref_free, atol=1e-5)
    # Explicitly exercise the z-tiled + halo path (tz=4 -> 2 z-tiles per volume).
    assert jnp.allclose(dilate_free(free_sup, tz=4), ref_free, atol=1e-5)

    print("KERNEL_OK")
</pallas_src>

<mosaic_0001>
module attributes {stable_mosaic.version = 11 : i64} {
  func.func @_fused_apply4x4_kernel(%arg0: i32, %arg1: memref<1x3x4x4xf32, #tpu.memory_space<vmem>>, %arg2: memref<1x3x128xf32, #tpu.memory_space<vmem>>, %arg3: memref<1x3x128xf32, #tpu.memory_space<vmem>>, %arg4: memref<1x3x128xf32, #tpu.memory_space<vmem>>, %arg5: memref<1x3x128xf32, #tpu.memory_space<vmem>>) attributes {dimension_semantics = [#tpu.dimension_semantics<parallel>], iteration_bounds = array<i64: 4>, scalar_prefetch = 0 : i64, scratch_operands = 0 : i64, tpu.core_type = #tpu.core_type<tc>, window_params = [{transform_indices = @transform_0, window_bounds = array<i64: 1, 3, 4, 4>}, {transform_indices = @transform_1, window_bounds = array<i64: 1, 3, 128>}, {transform_indices = @transform_2, window_bounds = array<i64: 1, 3, 128>}, {transform_indices = @transform_3, window_bounds = array<i64: 1, 3, 128>}, {transform_indices = @transform_4, window_bounds = array<i64: 1, 3, 128>}]} {
    %c0 = arith.constant 0 : index
    %c0_0 = arith.constant 0 : index
    %c0_1 = arith.constant 0 : index
    %0 = vector.load %arg2[%c0, %c0_0, %c0_1] : memref<1x3x128xf32, #tpu.memory_space<vmem>>, vector<1x3x128xf32>
    %1 = vector.extract_strided_slice %0 {offsets = [0, 0, 0], sizes = [1, 1, 128], strides = [1, 1, 1]} : vector<1x3x128xf32> to vector<1x1x128xf32>
    %2 = vector.extract_strided_slice %0 {offsets = [0, 1, 0], sizes = [1, 1, 128], strides = [1, 1, 1]} : vector<1x3x128xf32> to vector<1x1x128xf32>
    %3 = vector.extract_strided_slice %0 {offsets = [0, 2, 0], sizes = [1, 1, 128], strides = [1, 1, 1]} : vector<1x3x128xf32> to vector<1x1x128xf32>
    %c0_2 = arith.constant 0 : index
    %c0_3 = arith.constant 0 : index
    %c0_4 = arith.constant 0 : index
    %c0_5 = arith.constant 0 : index
    %4 = vector.load %arg1[%c0_2, %c0_3, %c0_4, %c0_5] : memref<1x3x4x4xf32, #tpu.memory_space<vmem>>, vector<1x3x4x4xf32>
    %5 = vector.extract_strided_slice %4 {offsets = [0, 0, 0, 0], sizes = [1, 1, 1, 1], strides = [1, 1, 1, 1]} : vector<1x3x4x4xf32> to vector<1x1x1x1xf32>
    %6 = vector.shape_cast %5 : vector<1x1x1x1xf32> to vector<1x1x1xf32>
    %7 = vector.extract_strided_slice %4 {offsets = [0, 0, 0, 1], sizes = [1, 1, 1, 1], strides = [1, 1, 1, 1]} : vector<1x3x4x4xf32> to vector<1x1x1x1xf32>
    %8 = vector.shape_cast %7 : vector<1x1x1x1xf32> to vector<1x1x1xf32>
    %9 = vector.extract_strided_slice %4 {offsets = [0, 0, 0, 2], sizes = [1, 1, 1, 1], strides = [1, 1, 1, 1]} : vector<1x3x4x4xf32> to vector<1x1x1x1xf32>
    %10 = vector.shape_cast %9 : vector<1x1x1x1xf32> to vector<1x1x1xf32>
    %11 = vector.extract_strided_slice %4 {offsets = [0, 0, 0, 3], sizes = [1, 1, 1, 1], strides = [1, 1, 1, 1]} : vector<1x3x4x4xf32> to vector<1x1x1x1xf32>
    %12 = vector.shape_cast %11 : vector<1x1x1x1xf32> to vector<1x1x1xf32>
    %13 = vector.broadcast %6 : vector<1x1x1xf32> to vector<1x1x128xf32>
    %14 = arith.mulf %13, %1 : vector<1x1x128xf32>
    %15 = vector.broadcast %8 : vector<1x1x1xf32> to vector<1x1x128xf32>
    %16 = arith.mulf %15, %2 : vector<1x1x128xf32>
    %17 = arith.addf %14, %16 : vector<1x1x128xf32>
    %18 = vector.broadcast %10 : vector<1x1x1xf32> to vector<1x1x128xf32>
    %19 = arith.mulf %18, %3 : vector<1x1x128xf32>
    %20 = arith.addf %17, %19 : vector<1x1x128xf32>
    %21 = vector.broadcast %12 : vector<1x1x1xf32> to vector<1x1x128xf32>
    %22 = arith.addf %20, %21 : vector<1x1x128xf32>
    %c0_6 = arith.constant 0 : index
    %c0_7 = arith.constant 0 : index
    %c0_8 = arith.constant 0 : index
    %23 = vector.load %arg3[%c0_6, %c0_7, %c0_8] : memref<1x3x128xf32, #tpu.memory_space<vmem>>, vector<1x1x128xf32>
    tpu.vector_store %arg3[%c0_6, %c0_7, %c0_8], %22 {strides = array<i32>} : memref<1x3x128xf32, #tpu.memory_space<vmem>>, vector<1x1x128xf32>,
    %24 = vector.extract_strided_slice %4 {offsets = [0, 0, 1, 0], sizes = [1, 1, 1, 1], strides = [1, 1, 1, 1]} : vector<1x3x4x4xf32> to vector<1x1x1x1xf32>
    %25 = vector.shape_cast %24 : vector<1x1x1x1xf32> to vector<1x1x1xf32>
    %26 = vector.extract_strided_slice %4 {offsets = [0, 0, 1, 1], sizes = [1, 1, 1, 1], strides = [1, 1, 1, 1]} : vector<1x3x4x4xf32> to vector<1x1x1x1xf32>
    %27 = vector.shape_cast %26 : vector<1x1x1x1xf32> to vector<1x1x1xf32>
    %28 = vector.extract_strided_slice %4 {offsets = [0, 0, 1, 2], sizes = [1, 1, 1, 1], strides = [1, 1, 1, 1]} : vector<1x3x4x4xf32> to vector<1x1x1x1xf32>
    %29 = vector.shape_cast %28 : vector<1x1x1x1xf32> to vector<1x1x1xf32>
    %30 = vector.extract_strided_slice %4 {offsets = [0, 0, 1, 3], sizes = [1, 1, 1, 1], strides = [1, 1, 1, 1]} : vector<1x3x4x4xf32> to vector<1x1x1x1xf32>
    %31 = vector.shape_cast %30 : vector<1x1x1x1xf32> to vector<1x1x1xf32>
    %32 = vector.broadcast %25 : vector<1x1x1xf32> to vector<1x1x128xf32>
    %33 = arith.mulf %32, %1 : vector<1x1x128xf32>
    %34 = vector.broadcast %27 : vector<1x1x1xf32> to vector<1x1x128xf32>
    %35 = arith.mulf %34, %2 : vector<1x1x128xf32>
    %36 = arith.addf %33, %35 : vector<1x1x128xf32>
    %37 = vector.broadcast %29 : vector<1x1x1xf32> to vector<1x1x128xf32>
    %38 = arith.mulf %37, %3 : vector<1x1x128xf32>
    %39 = arith.addf %36, %38 : vector<1x1x128xf32>
    %40 = vector.broadcast %31 : vector<1x1x1xf32> to vector<1x1x128xf32>
    %41 = arith.addf %39, %40 : vector<1x1x128xf32>
    %c0_9 = arith.constant 0 : index
    %c1 = arith.constant 1 : index
    %c0_10 = arith.constant 0 : index
    %42 = vector.load %arg3[%c0_9, %c1, %c0_10] : memref<1x3x128xf32, #tpu.memory_space<vmem>>, vector<1x1x128xf32>
    tpu.vector_store %arg3[%c0_9, %c1, %c0_10], %41 {strides = array<i32>} : memref<1x3x128xf32, #tpu.memory_space<vmem>>, vector<1x1x128xf32>,
    %43 = vector.extract_strided_slice %4 {offsets = [0, 0, 2, 0], sizes = [1, 1, 1, 1], strides = [1, 1, 1, 1]} : vector<1x3x4x4xf32> to vector<1x1x1x1xf32>
    %44 = vector.shape_cast %43 : vector<1x1x1x1xf32> to vector<1x1x1xf32>
    %45 = vector.extract_strided_slice %4 {offsets = [0, 0, 2, 1], sizes = [1, 1, 1, 1], strides = [1, 1, 1, 1]} : vector<1x3x4x4xf32> to vector<1x1x1x1xf32>
    %46 = vector.shape_cast %45 : vector<1x1x1x1xf32> to vector<1x1x1xf32>
    %47 = vector.extract_strided_slice %4 {offsets = [0, 0, 2, 2], sizes = [1, 1, 1, 1], strides = [1, 1, 1, 1]} : vector<1x3x4x4xf32> to vector<1x1x1x1xf32>
    %48 = vector.shape_cast %47 : vector<1x1x1x1xf32> to vector<1x1x1xf32>
    %49 = vector.extract_strided_slice %4 {offsets = [0, 0, 2, 3], sizes = [1, 1, 1, 1], strides = [1, 1, 1, 1]} : vector<1x3x4x4xf32> to vector<1x1x1x1xf32>
    %50 = vector.shape_cast %49 : vector<1x1x1x1xf32> to vector<1x1x1xf32>
    %51 = vector.broadcast %44 : vector<1x1x1xf32> to vector<1x1x128xf32>
    %52 = arith.mulf %51, %1 : vector<1x1x128xf32>
    %53 = vector.broadcast %46 : vector<1x1x1xf32> to vector<1x1x128xf32>
    %54 = arith.mulf %53, %2 : vector<1x1x128xf32>
    %55 = arith.addf %52, %54 : vector<1x1x128xf32>
    %56 = vector.broadcast %48 : vector<1x1x1xf32> to vector<1x1x128xf32>
    %57 = arith.mulf %56, %3 : vector<1x1x128xf32>
    %58 = arith.addf %55, %57 : vector<1x1x128xf32>
    %59 = vector.broadcast %50 : vector<1x1x1xf32> to vector<1x1x128xf32>
    %60 = arith.addf %58, %59 : vector<1x1x128xf32>
    %c0_11 = arith.constant 0 : index
    %c2 = arith.constant 2 : index
    %c0_12 = arith.constant 0 : index
    %61 = vector.load %arg3[%c0_11, %c2, %c0_12] : memref<1x3x128xf32, #tpu.memory_space<vmem>>, vector<1x1x128xf32>
    tpu.vector_store %arg3[%c0_11, %c2, %c0_12], %60 {strides = array<i32>} : memref<1x3x128xf32, #tpu.memory_space<vmem>>, vector<1x1x128xf32>,
    %62 = vector.extract_strided_slice %4 {offsets = [0, 1, 0, 0], sizes = [1, 1, 1, 1], strides = [1, 1, 1, 1]} : vector<1x3x4x4xf32> to vector<1x1x1x1xf32>
    %63 = vector.shape_cast %62 : vector<1x1x1x1xf32> to vector<1x1x1xf32>
    %64 = vector.extract_strided_slice %4 {offsets = [0, 1, 0, 1], sizes = [1, 1, 1, 1], strides = [1, 1, 1, 1]} : vector<1x3x4x4xf32> to vector<1x1x1x1xf32>
    %65 = vector.shape_cast %64 : vector<1x1x1x1xf32> to vector<1x1x1xf32>
    %66 = vector.extract_strided_slice %4 {offsets = [0, 1, 0, 2], sizes = [1, 1, 1, 1], strides = [1, 1, 1, 1]} : vector<1x3x4x4xf32> to vector<1x1x1x1xf32>
    %67 = vector.shape_cast %66 : vector<1x1x1x1xf32> to vector<1x1x1xf32>
    %68 = vector.extract_strided_slice %4 {offsets = [0, 1, 0, 3], sizes = [1, 1, 1, 1], strides = [1, 1, 1, 1]} : vector<1x3x4x4xf32> to vector<1x1x1x1xf32>
    %69 = vector.shape_cast %68 : vector<1x1x1x1xf32> to vector<1x1x1xf32>
    %70 = vector.broadcast %63 : vector<1x1x1xf32> to vector<1x1x128xf32>
    %71 = arith.mulf %70, %1 : vector<1x1x128xf32>
    %72 = vector.broadcast %65 : vector<1x1x1xf32> to vector<1x1x128xf32>
    %73 = arith.mulf %72, %2 : vector<1x1x128xf32>
    %74 = arith.addf %71, %73 : vector<1x1x128xf32>
    %75 = vector.broadcast %67 : vector<1x1x1xf32> to vector<1x1x128xf32>
    %76 = arith.mulf %75, %3 : vector<1x1x128xf32>
    %77 = arith.addf %74, %76 : vector<1x1x128xf32>
    %78 = vector.broadcast %69 : vector<1x1x1xf32> to vector<1x1x128xf32>
    %79 = arith.addf %77, %78 : vector<1x1x128xf32>
    %c0_13 = arith.constant 0 : index
    %c0_14 = arith.constant 0 : index
    %c0_15 = arith.constant 0 : index
    %80 = vector.load %arg4[%c0_13, %c0_14, %c0_15] : memref<1x3x128xf32, #tpu.memory_space<vmem>>, vector<1x1x128xf32>
    tpu.vector_store %arg4[%c0_13, %c0_14, %c0_15], %79 {strides = array<i32>} : memref<1x3x128xf32, #tpu.memory_space<vmem>>, vector<1x1x128xf32>,
    %81 = vector.extract_strided_slice %4 {offsets = [0, 1, 1, 0], sizes = [1, 1, 1, 1], strides = [1, 1, 1, 1]} : vector<1x3x4x4xf32> to vector<1x1x1x1xf32>
    %82 = vector.shape_cast %81 : vector<1x1x1x1xf32> to vector<1x1x1xf32>
    %83 = vector.extract_strided_slice %4 {offsets = [0, 1, 1, 1], sizes = [1, 1, 1, 1], strides = [1, 1, 1, 1]} : vector<1x3x4x4xf32> to vector<1x1x1x1xf32>
    %84 = vector.shape_cast %83 : vector<1x1x1x1xf32> to vector<1x1x1xf32>
    %85 = vector.extract_strided_slice %4 {offsets = [0, 1, 1, 2], sizes = [1, 1, 1, 1], strides = [1, 1, 1, 1]} : vector<1x3x4x4xf32> to vector<1x1x1x1xf32>
    %86 = vector.shape_cast %85 : vector<1x1x1x1xf32> to vector<1x1x1xf32>
    %87 = vector.extract_strided_slice %4 {offsets = [0, 1, 1, 3], sizes = [1, 1, 1, 1], strides = [1, 1, 1, 1]} : vector<1x3x4x4xf32> to vector<1x1x1x1xf32>
    %88 = vector.shape_cast %87 : vector<1x1x1x1xf32> to vector<1x1x1xf32>
    %89 = vector.broadcast %82 : vector<1x1x1xf32> to vector<1x1x128xf32>
    %90 = arith.mulf %89, %1 : vector<1x1x128xf32>
    %91 = vector.broadcast %84 : vector<1x1x1xf32> to vector<1x1x128xf32>
    %92 = arith.mulf %91, %2 : vector<1x1x128xf32>
    %93 = arith.addf %90, %92 : vector<1x1x128xf32>
    %94 = vector.broadcast %86 : vector<1x1x1xf32> to vector<1x1x128xf32>
    %95 = arith.mulf %94, %3 : vector<1x1x128xf32>
    %96 = arith.addf %93, %95 : vector<1x1x128xf32>
    %97 = vector.broadcast %88 : vector<1x1x1xf32> to vector<1x1x128xf32>
    %98 = arith.addf %96, %97 : vector<1x1x128xf32>
    %c0_16 = arith.constant 0 : index
    %c1_17 = arith.constant 1 : index
    %c0_18 = arith.constant 0 : index
    %99 = vector.load %arg4[%c0_16, %c1_17, %c0_18] : memref<1x3x128xf32, #tpu.memory_space<vmem>>, vector<1x1x128xf32>
    tpu.vector_store %arg4[%c0_16, %c1_17, %c0_18], %98 {strides = array<i32>} : memref<1x3x128xf32, #tpu.memory_space<vmem>>, vector<1x1x128xf32>,
    %100 = vector.extract_strided_slice %4 {offsets = [0, 1, 2, 0], sizes = [1, 1, 1, 1], strides = [1, 1, 1, 1]} : vector<1x3x4x4xf32> to vector<1x1x1x1xf32>
    %101 = vector.shape_cast %100 : vector<1x1x1x1xf32> to vector<1x1x1xf32>
    %102 = vector.extract_strided_slice %4 {offsets = [0, 1, 2, 1], sizes = [1, 1, 1, 1], strides = [1, 1, 1, 1]} : vector<1x3x4x4xf32> to vector<1x1x1x1xf32>
    %103 = vector.shape_cast %102 : vector<1x1x1x1xf32> to vector<1x1x1xf32>
    %104 = vector.extract_strided_slice %4 {offsets = [0, 1, 2, 2], sizes = [1, 1, 1, 1], strides = [1, 1, 1, 1]} : vector<1x3x4x4xf32> to vector<1x1x1x1xf32>
    %105 = vector.shape_cast %104 : vector<1x1x1x1xf32> to vector<1x1x1xf32>
    %106 = vector.extract_strided_slice %4 {offsets = [0, 1, 2, 3], sizes = [1, 1, 1, 1], strides = [1, 1, 1, 1]} : vector<1x3x4x4xf32> to vector<1x1x1x1xf32>
    %107 = vector.shape_cast %106 : vector<1x1x1x1xf32> to vector<1x1x1xf32>
    %108 = vector.broadcast %101 : vector<1x1x1xf32> to vector<1x1x128xf32>
    %109 = arith.mulf %108, %1 : vector<1x1x128xf32>
    %110 = vector.broadcast %103 : vector<1x1x1xf32> to vector<1x1x128xf32>
    %111 = arith.mulf %110, %2 : vector<1x1x128xf32>
    %112 = arith.addf %109, %111 : vector<1x1x128xf32>
    %113 = vector.broadcast %105 : vector<1x1x1xf32> to vector<1x1x128xf32>
    %114 = arith.mulf %113, %3 : vector<1x1x128xf32>
    %115 = arith.addf %112, %114 : vector<1x1x128xf32>
    %116 = vector.broadcast %107 : vector<1x1x1xf32> to vector<1x1x128xf32>
    %117 = arith.addf %115, %116 : vector<1x1x128xf32>
    %c0_19 = arith.constant 0 : index
    %c2_20 = arith.constant 2 : index
    %c0_21 = arith.constant 0 : index
    %118 = vector.load %arg4[%c0_19, %c2_20, %c0_21] : memref<1x3x128xf32, #tpu.memory_space<vmem>>, vector<1x1x128xf32>
    tpu.vector_store %arg4[%c0_19, %c2_20, %c0_21], %117 {strides = array<i32>} : memref<1x3x128xf32, #tpu.memory_space<vmem>>, vector<1x1x128xf32>,
    %119 = vector.extract_strided_slice %4 {offsets = [0, 2, 0, 0], sizes = [1, 1, 1, 1], strides = [1, 1, 1, 1]} : vector<1x3x4x4xf32> to vector<1x1x1x1xf32>
    %120 = vector.shape_cast %119 : vector<1x1x1x1xf32> to vector<1x1x1xf32>
    %121 = vector.extract_strided_slice %4 {offsets = [0, 2, 0, 1], sizes = [1, 1, 1, 1], strides = [1, 1, 1, 1]} : vector<1x3x4x4xf32> to vector<1x1x1x1xf32>
    %122 = vector.shape_cast %121 : vector<1x1x1x1xf32> to vector<1x1x1xf32>
    %123 = vector.extract_strided_slice %4 {offsets = [0, 2, 0, 2], sizes = [1, 1, 1, 1], strides = [1, 1, 1, 1]} : vector<1x3x4x4xf32> to vector<1x1x1x1xf32>
    %124 = vector.shape_cast %123 : vector<1x1x1x1xf32> to vector<1x1x1xf32>
    %125 = vector.extract_strided_slice %4 {offsets = [0, 2, 0, 3], sizes = [1, 1, 1, 1], strides = [1, 1, 1, 1]} : vector<1x3x4x4xf32> to vector<1x1x1x1xf32>
    %126 = vector.shape_cast %125 : vector<1x1x1x1xf32> to vector<1x1x1xf32>
    %127 = vector.broadcast %120 : vector<1x1x1xf32> to vector<1x1x128xf32>
    %128 = arith.mulf %127, %1 : vector<1x1x128xf32>
    %129 = vector.broadcast %122 : vector<1x1x1xf32> to vector<1x1x128xf32>
    %130 = arith.mulf %129, %2 : vector<1x1x128xf32>
    %131 = arith.addf %128, %130 : vector<1x1x128xf32>
    %132 = vector.broadcast %124 : vector<1x1x1xf32> to vector<1x1x128xf32>
    %133 = arith.mulf %132, %3 : vector<1x1x128xf32>
    %134 = arith.addf %131, %133 : vector<1x1x128xf32>
    %135 = vector.broadcast %126 : vector<1x1x1xf32> to vector<1x1x128xf32>
    %136 = arith.addf %134, %135 : vector<1x1x128xf32>
    %c0_22 = arith.constant 0 : index
    %c0_23 = arith.constant 0 : index
    %c0_24 = arith.constant 0 : index
    %137 = vector.load %arg5[%c0_22, %c0_23, %c0_24] : memref<1x3x128xf32, #tpu.memory_space<vmem>>, vector<1x1x128xf32>
    tpu.vector_store %arg5[%c0_22, %c0_23, %c0_24], %136 {strides = array<i32>} : memref<1x3x128xf32, #tpu.memory_space<vmem>>, vector<1x1x128xf32>,
    %138 = vector.extract_strided_slice %4 {offsets = [0, 2, 1, 0], sizes = [1, 1, 1, 1], strides = [1, 1, 1, 1]} : vector<1x3x4x4xf32> to vector<1x1x1x1xf32>
    %139 = vector.shape_cast %138 : vector<1x1x1x1xf32> to vector<1x1x1xf32>
    %140 = vector.extract_strided_slice %4 {offsets = [0, 2, 1, 1], sizes = [1, 1, 1, 1], strides = [1, 1, 1, 1]} : vector<1x3x4x4xf32> to vector<1x1x1x1xf32>
    %141 = vector.shape_cast %140 : vector<1x1x1x1xf32> to vector<1x1x1xf32>
    %142 = vector.extract_strided_slice %4 {offsets = [0, 2, 1, 2], sizes = [1, 1, 1, 1], strides = [1, 1, 1, 1]} : vector<1x3x4x4xf32> to vector<1x1x1x1xf32>
    %143 = vector.shape_cast %142 : vector<1x1x1x1xf32> to vector<1x1x1xf32>
    %144 = vector.extract_strided_slice %4 {offsets = [0, 2, 1, 3], sizes = [1, 1, 1, 1], strides = [1, 1, 1, 1]} : vector<1x3x4x4xf32> to vector<1x1x1x1xf32>
    %145 = vector.shape_cast %144 : vector<1x1x1x1xf32> to vector<1x1x1xf32>
    %146 = vector.broadcast %139 : vector<1x1x1xf32> to vector<1x1x128xf32>
    %147 = arith.mulf %146, %1 : vector<1x1x128xf32>
    %148 = vector.broadcast %141 : vector<1x1x1xf32> to vector<1x1x128xf32>
    %149 = arith.mulf %148, %2 : vector<1x1x128xf32>
    %150 = arith.addf %147, %149 : vector<1x1x128xf32>
    %151 = vector.broadcast %143 : vector<1x1x1xf32> to vector<1x1x128xf32>
    %152 = arith.mulf %151, %3 : vector<1x1x128xf32>
    %153 = arith.addf %150, %152 : vector<1x1x128xf32>
    %154 = vector.broadcast %145 : vector<1x1x1xf32> to vector<1x1x128xf32>
    %155 = arith.addf %153, %154 : vector<1x1x128xf32>
    %c0_25 = arith.constant 0 : index
    %c1_26 = arith.constant 1 : index
    %c0_27 = arith.constant 0 : index
    %156 = vector.load %arg5[%c0_25, %c1_26, %c0_27] : memref<1x3x128xf32, #tpu.memory_space<vmem>>, vector<1x1x128xf32>
    tpu.vector_store %arg5[%c0_25, %c1_26, %c0_27], %155 {strides = array<i32>} : memref<1x3x128xf32, #tpu.memory_space<vmem>>, vector<1x1x128xf32>,
    %157 = vector.extract_strided_slice %4 {offsets = [0, 2, 2, 0], sizes = [1, 1, 1, 1], strides = [1, 1, 1, 1]} : vector<1x3x4x4xf32> to vector<1x1x1x1xf32>
    %158 = vector.shape_cast %157 : vector<1x1x1x1xf32> to vector<1x1x1xf32>
    %159 = vector.extract_strided_slice %4 {offsets = [0, 2, 2, 1], sizes = [1, 1, 1, 1], strides = [1, 1, 1, 1]} : vector<1x3x4x4xf32> to vector<1x1x1x1xf32>
    %160 = vector.shape_cast %159 : vector<1x1x1x1xf32> to vector<1x1x1xf32>
    %161 = vector.extract_strided_slice %4 {offsets = [0, 2, 2, 2], sizes = [1, 1, 1, 1], strides = [1, 1, 1, 1]} : vector<1x3x4x4xf32> to vector<1x1x1x1xf32>
    %162 = vector.shape_cast %161 : vector<1x1x1x1xf32> to vector<1x1x1xf32>
    %163 = vector.extract_strided_slice %4 {offsets = [0, 2, 2, 3], sizes = [1, 1, 1, 1], strides = [1, 1, 1, 1]} : vector<1x3x4x4xf32> to vector<1x1x1x1xf32>
    %164 = vector.shape_cast %163 : vector<1x1x1x1xf32> to vector<1x1x1xf32>
    %165 = vector.broadcast %158 : vector<1x1x1xf32> to vector<1x1x128xf32>
    %166 = arith.mulf %165, %1 : vector<1x1x128xf32>
    %167 = vector.broadcast %160 : vector<1x1x1xf32> to vector<1x1x128xf32>
    %168 = arith.mulf %167, %2 : vector<1x1x128xf32>
    %169 = arith.addf %166, %168 : vector<1x1x128xf32>
    %170 = vector.broadcast %162 : vector<1x1x1xf32> to vector<1x1x128xf32>
    %171 = arith.mulf %170, %3 : vector<1x1x128xf32>
    %172 = arith.addf %169, %171 : vector<1x1x128xf32>
    %173 = vector.broadcast %164 : vector<1x1x1xf32> to vector<1x1x128xf32>
    %174 = arith.addf %172, %173 : vector<1x1x128xf32>
    %c0_28 = arith.constant 0 : index
    %c2_29 = arith.constant 2 : index
    %c0_30 = arith.constant 0 : index
    %175 = vector.load %arg5[%c0_28, %c2_29, %c0_30] : memref<1x3x128xf32, #tpu.memory_space<vmem>>, vector<1x1x128xf32>
    tpu.vector_store %arg5[%c0_28, %c2_29, %c0_30], %174 {strides = array<i32>} : memref<1x3x128xf32, #tpu.memory_space<vmem>>, vector<1x1x128xf32>,
    return
  }
  func.func @transform_0(%arg0: i32) -> (i32, i32, i32, i32) {
    %c0_i32 = arith.constant 0 : i32
    %c0_i32_0 = arith.constant 0 : i32
    %c0_i32_1 = arith.constant 0 : i32
    %c0_i32_2 = arith.constant 0 : i32
    return %arg0, %c0_i32, %c0_i32_0, %c0_i32_1 : i32, i32, i32, i32
  }
  func.func @transform_1(%arg0: i32) -> (i32, i32, i32) {
    %c0_i32 = arith.constant 0 : i32
    %c0_i32_0 = arith.constant 0 : i32
    %c0_i32_1 = arith.constant 0 : i32
    return %arg0, %c0_i32, %c0_i32_0 : i32, i32, i32
  }
  func.func @transform_2(%arg0: i32) -> (i32, i32, i32) {
    %c0_i32 = arith.constant 0 : i32
    %c0_i32_0 = arith.constant 0 : i32
    %c0_i32_1 = arith.constant 0 : i32
    return %arg0, %c0_i32, %c0_i32_0 : i32, i32, i32
  }
  func.func @transform_3(%arg0: i32) -> (i32, i32, i32) {
    %c0_i32 = arith.constant 0 : i32
    %c0_i32_0 = arith.constant 0 : i32
    %c0_i32_1 = arith.constant 0 : i32
    return %arg0, %c0_i32, %c0_i32_0 : i32, i32, i32
  }
  func.func @transform_4(%arg0: i32) -> (i32, i32, i32) {
    %c0_i32 = arith.constant 0 : i32
    %c0_i32_0 = arith.constant 0 : i32
    %c0_i32_1 = arith.constant 0 : i32
    return %arg0, %c0_i32, %c0_i32_0 : i32, i32, i32
  }
}

</mosaic_0001>

<bundles_post_ra>
// kernel: tpu_custom_call.1
= control target key start
LH: loop header
LB: loop body
LE: loop exit
PB: predicated region body
PF: predicated region fallthrough
CT: control target
= control target key end

     0   :  { %10 = vsyncpa [#allocation3], 0  ;;  %s809_s0 = inlined_call_operand.hbm [shape: f32[4,3,4,4], index: 0, kind: input, shape index: {}]   ;;  %s810_s1 = inlined_call_operand.vmem [shape: f32[4,3,128], index: 1, kind: input, shape index: {}]   ;;  %s811_s2 = inlined_call_operand.vmem [shape: f32[4,3,128], index: 2, kind: output, shape index: {0}]   ;;  %s812_s3 = inlined_call_operand.vmem [shape: f32[4,3,128], index: 3, kind: output, shape index: {1}]   ;;  %s813_s4 = inlined_call_operand.vmem [shape: f32[4,3,128], index: 4, kind: output, shape index: {2}]  }
   0x1   :  { %12 = vsyncpa [#allocation3 + $0x1], 0  ;;  %s686_s15 = smov 0   ;;  %s688_s16 = smov 0  }
   0x2   :  { %s690_s17 = smov 0   ;;  %s692_s18 = smov 0  }
   0x3 LB: > { %s705_s19 = sadd.s32 4294967295, %s652_s18   ;;  %s708_s20 = sadd.s32 1, %s652_s18   ;;  %s652_s18 = sphi %s692_s18, %s820_s18   ;;  %s648_s17 = sphi %s690_s17, %s819_s17   ;;  %s644_s16 = sphi %s688_s16, %s818_s16   ;;  %s640_s15 = sphi %s686_s15, %s817_s15  }
   0x4   : > { %s22_s21 = ssub.s32 %s652_s18, %s708_s20  ;;  %s25_s22 = sadd.s32 1, %s648_s17 }
   0x5   : > { %p23_p0 = scmp.eq.s32.totalorder %s22_s21, 0  ;;  %p32_p1 = scmp.ne.s32.totalorder %s648_s17, %s644_s16 }
   0x6   : > { %p33_p2 = scmp.eq.s32.totalorder %s652_s18, 0  ;;  %p38_p3 = scmp.ne.s32.totalorder %s644_s16, %s640_s15 }
   0x7   : > { %s718_s23 = scalar_select %p23_p0, %s648_s17, %s25_s22  }
   0x8   : > { %p34_p4 = por %p33_p2, %p32_p1  ;;  %p39_p5 = scmp.eq.s32.totalorder %s705_s19, 0 }
   0x9   : > { %p540_p6 = scmp.lt.s32.totalorder %s652_s18, 4  ;;  %s166_s25 = sand.u32 1, %s648_s17  }
   0xa   : > { %p722_p7 = por %p39_p5, %p38_p3  ;;  %s531_s26 = smul.u32 12, %s166_s25 }
   0xb   : > { %s532_s27 = smul.u32 192, %s652_s18  ;;  %p728_p8 = pnand %p540_p6, %p34_p4 }
   0xc   : > { %s170_s6 = scalar_lea.vmem [#allocation2], %s531_s26  ;;  %s740_s8 = scalar_lea.sflag [#allocation3], %s166_s25 }
   0xd   : > { %s735_s5 = scalar_lea.hbm %s809_s0, %s532_s27  ;;  %s177_s7 = sshll.u32 %s170_s6, 4  ;;  %s737_s7 = int_to_ptr.vmem [resolvable:$true] %s177_s7 }
   0xe   : > { %s588_s9 = scalar_lea.hbm %s735_s5, 192  ;;  %p590_p11 = pneg %p728_p8 }
   0xf   : > { %p589_p10 = scmp.ne.s32.totalorder %s735_s5, %s588_s9  ;;  %s593_s12 = scalar_lea.hbm %s809_s0, 768 }
  0x10   : > { %p594_p0 = scmp.lt.u32.totalorder %s735_s5, %s809_s0  ;;  %p595_p1 = scmp.lt.u32.totalorder %s593_s12, %s588_s9 }
  0x11   : > { %p591_p12 = pnand %p590_p11, %p589_p10  ;;  %p597_p3 = scmp.lt.u32.totalorder %s588_s9, %s735_s5 }
  0x12   : > { %p596_p2 = por %p595_p1, %p594_p0 }
  0x13   : > { %p592_p13 = pneg %p591_p12 }
  0x14   : > { %p598_p4 = por %p597_p3, %p596_p2 }
  0x16   : > { %p599_p5 = pnand %p598_p4, %p592_p13 }
  0x18   : > { %602 = shalt.err (!%p599_p5)
}
  0x19   : > { %s603_s15 = scalar_lea.vmem %s737_s7, 192  ;;  %s654_s21 = smov [#allocation2]  }
  0x1a   : > { %p604_p6 = scmp.ne.s32.totalorder %s737_s7, %s603_s15  ;;  %s608_s22 = sshll.u32 %s654_s21, 4  ;;  %s609_s22 = int_to_ptr.vmem [resolvable:$false] %s608_s22 }
  0x1b   : > { %s610_s25 = scalar_lea.vmem %s609_s22, 384  ;;  %p611_p9 = scmp.lt.s32.totalorder %s737_s7, %s609_s22 }
  0x1c   : > { %p606_p10 = pnand %p604_p6, %p590_p11  ;;  %p612_p0 = scmp.lt.s32.totalorder %s610_s25, %s603_s15 }
  0x1e   : > { %p607_p12 = pneg %p606_p10  ;;  %p613_p1 = por %p612_p0, %p611_p9 }
  0x20   : > { %p614_p2 = pnand %p613_p1, %p607_p12 }
  0x22   : > { %617 = shalt.err (!%p614_p2)
}
  0x23   : > { %s655_s26 = smov 64   ;;  %s656_s27 = smov 4  }
  0x24   : > { %539 = dma.hbm_to_vmem [thread:$0]  (!%p728_p8), %s735_s5, 192, %s737_s7, %s740_s8, %s655_s26, %s655_s26, %s656_s27  }
  0x25   : > { %p192_p11 = scmp.lt.s32.totalorder %s652_s18, 5  ;;  %p816_p13 = scmp.ge.s32.totalorder %s652_s18, 1 }
  0x27   : > { %p193_p3 = pnand %p816_p13, %p192_p11 }
  0x28   : > { %s198_s29 = sand.u32 (!%p193_p3), 1, %s644_s16  }
  0x29   : > { %196 = sbr.rel (%p193_p3) target bundleno = 211 (0xd3), region = 28  ;;  %s199_s6 = scalar_lea.sflag (!%p193_p3), [#allocation3], %s198_s29 }
  0x2a   : > { %s533_s30 = smul.u32 (!%p193_p3), 12, %s198_s29 }
  0x2c   : > { %s202_s9 = scalar_lea.vmem (!%p193_p3), [#allocation2], %s533_s30 }
  0x30   : > { %635 = dma.done.wait (%p722_p7), %s199_s6, 192  }
  0x31   : > { %637 = vsyncadd (%p722_p7), %s199_s6, 4294967104  ;;  %v657_v0 = vmov 0   ;;  %v256_v1 = vld [vmem:[%s202_s9 + $0x4] sm:$0xf]  ;;  %v255_v2 = vld [vmem:[%s202_s9] sm:$0xf] }
  0x32   : > { %581 = vset.pattern.permute.xlu1 %v657_v0  ;;  %579 = vset.pattern.permute.xlu0 %v657_v0  ;;  %v658_v3 = vmov 1   ;;  %v257_v4 = vld [vmem:[%s202_s9 + $0x8] sm:$0xf]  ;;  %v659_v5 = vmov 2   ;;  %v660_v6 = vmov 3   ;;  %p238_p7 = scmp.lt.s32.totalorder %s705_s19, 3 }
  0x33   : > { %307 = vperm.xlu1 %581, %v256_v1   ;;  %260 = vperm.xlu0 %579, %v255_v2  }
  0x34   : > { %s822_s19 = smov (!%p238_p7, %s705_s19), 3 }
  0x35   : > { %s778_s18 = sshll.u32 %s822_s19, 2 }
  0x36   : > { %s241_s5 = scalar_lea.vmem %s810_s1, %s778_s18  ;;  %s249_s8 = scalar_lea.vmem %s812_s3, %s778_s18 }
  0x37   : > { %582 = vset.pattern.permute.xlu1 %v658_v3  ;;  %580 = vset.pattern.permute.xlu0 %v658_v3  ;;  %v254_v9 = vld [vmem:[%s241_s5] sm:$0x7]  ;;  %s245_s12 = scalar_lea.vmem %s811_s2, %s778_s18  ;;  %s253_s15 = scalar_lea.vmem %s813_s4, %s778_s18 }
  0x38   : > { %312 = vperm.xlu1 %582, %v256_v1   ;;  %265 = vperm.xlu0 %580, %v255_v2   ;;  %v269_v12 = vrot.slane %v254_v9, 1  ;;  %v287_v13 = vrot.slane %v254_v9, 7  ;;  %v296_v14 = vrot.slane %v254_v9, 6  ;;  %v277_v20 = vrot.slane %v254_v9, 2 }
  0x3c   : > { %583 = vset.pattern.permute.xlu1 %v657_v0  ;;  %350 = vperm.xlu0 %580, %v257_v4  }
  0x3d   : > { %345 = vperm.xlu1 %583, %v257_v4  }
  0x40   : > { %585 = vset.pattern.permute.xlu0 %v659_v5 }
  0x41   : > { %584 = vset.pattern.permute.xlu1 %v659_v5  ;;  %318 = vperm.xlu0 %585, %v256_v1  }
  0x42   : > { %274 = vperm.xlu1 %584, %v255_v2  }
  0x45   : > { %587 = vset.pattern.permute.xlu0 %v660_v6 }
  0x46   : > { %356 = vperm.xlu1 %584, %v257_v4   ;;  %324 = vperm.xlu0 %587, %v256_v1  }
  0x4a   : > { %586 = vset.pattern.permute.xlu1 %v660_v6 }
  0x4b   : > { %282 = vperm.xlu1 %586, %v255_v2  }
  0x4f   : > { %362 = vperm.xlu1 %586, %v257_v4  }
  0xb2   : > { %v308_v7 = vpop.permute.xlu1 %307  ;;  %v261_v8 = vpop.permute.xlu0 %260 }
  0xb3   : > { %v310_v21 = vmul.f32 %v308_v7, %v254_v9  ;;  %v329_v22 = vmul.f32 %v308_v7, %v287_v13  ;;  %v336_v23 = vmul.f32 %v308_v7, %v296_v14  ;;  %v263_v24 = vmul.f32 %v261_v8, %v254_v9 }
  0xb4   : > { %v289_v25 = vmul.f32 %v287_v13, %v261_v8  ;;  %v298_v26 = vmul.f32 %v296_v14, %v261_v8 }
  0xb7   : > { %v313_v10 = vpop.permute.xlu1 %312  ;;  %v266_v11 = vpop.permute.xlu0 %265 }
  0xb8   : > { %v315_v16 = vmul.f32 %v313_v10, %v269_v12  ;;  %v330_v17 = vmul.f32 %v313_v10, %v254_v9  ;;  %v337_v19 = vmul.f32 %v313_v10, %v287_v13  ;;  %v271_v27 = vmul.f32 %v269_v12, %v266_v11 }
  0xb9   : > { %v290_v30 = vmul.f32 %v266_v11, %v254_v9  ;;  %v299_v31 = vmul.f32 %v287_v13, %v266_v11 }
  0xba   : > { %v316_v28 = vadd.f32 %v315_v16, %v310_v21  ;;  %v331_v29 = vadd.f32 %v330_v17, %v329_v22  ;;  %v338_v33 = vadd.f32 %v337_v19, %v336_v23  ;;  %v272_v41 = vadd.f32 %v271_v27, %v263_v24 }
  0xbb   : > { %v351_v15 = vpop.permute.xlu0 %350  ;;  %v291_v44 = vadd.f32 %v290_v30, %v289_v25  ;;  %v300_v45 = vadd.f32 %v299_v31, %v298_v26 }
  0xbc   : > { %v346_v18 = vpop.permute.xlu1 %345  ;;  %v353_v46 = vmul.f32 %v351_v15, %v269_v12  ;;  %v368_v52 = vmul.f32 %v351_v15, %v254_v9  ;;  %v375_v55 = vmul.f32 %v351_v15, %v287_v13 }
  0xbd   : > { %v348_v50 = vmul.f32 %v346_v18, %v254_v9  ;;  %v367_v51 = vmul.f32 %v346_v18, %v287_v13  ;;  %v374_v54 = vmul.f32 %v346_v18, %v296_v14 }
  0xbf   : > { %v354_v0 = vadd.f32 %v353_v46, %v348_v50  ;;  %v369_v1 = vadd.f32 %v368_v52, %v367_v51  ;;  %v376_v3 = vadd.f32 %v375_v55, %v374_v54 }
  0xc0   : > { %v319_v32 = vpop.permute.xlu0 %318 }
  0xc1   : > { %v321_v34 = vmul.f32 %v319_v32, %v277_v20  ;;  %v332_v35 = vmul.f32 %v319_v32, %v269_v12  ;;  %v339_v36 = vmul.f32 %v319_v32, %v254_v9  ;;  %v275_v37 = vpop.permute.xlu1 %274 }
  0xc2   : > { %v279_v42 = vmul.f32 %v277_v20, %v275_v37  ;;  %v292_v43 = vmul.f32 %v275_v37, %v269_v12  ;;  %v301_v47 = vmul.f32 %v275_v37, %v254_v9 }
  0xc3   : > { %v322_v38 = vadd.f32 %v321_v34, %v316_v28  ;;  %v333_v39 = vadd.f32 %v332_v35, %v331_v29  ;;  %v340_v40 = vadd.f32 %v339_v36, %v338_v33 }
  0xc4   : > { %v280_v58 = vadd.f32 %v279_v42, %v272_v41  ;;  %v293_v59 = vadd.f32 %v292_v43, %v291_v44  ;;  %v302_v63 = vadd.f32 %v301_v47, %v300_v45 }
  0xc5   : > { %v357_v48 = vpop.permute.xlu1 %356  ;;  %v325_v49 = vpop.permute.xlu0 %324 }
  0xc6   : > { %v327_v53 = vadd.f32 %v325_v49, %v322_v38  ;;  %v334_v56 = vadd.f32 %v333_v39, %v325_v49  ;;  %v341_v57 = vadd.f32 %v340_v40, %v325_v49  ;;  %v359_v60 = vmul.f32 %v357_v48, %v277_v20 }
  0xc7   : > { %v370_v61 = vmul.f32 %v357_v48, %v269_v12  ;;  %v377_v62 = vmul.f32 %v357_v48, %v254_v9 }
  0xc8   : > { %328 = vst [vmem:[%s249_s8] sm:$0x1] %v327_v53  ;;  %335 = vst [vmem:[%s249_s8] sm:$0x2] %v334_v56  ;;  %v360_v7 = vadd.f32 %v359_v60, %v354_v0 }
  0xc9   : > { %342 = vst [vmem:[%s249_s8] sm:$0x4] %v341_v57  ;;  %v371_v8 = vadd.f32 %v370_v61, %v369_v1  ;;  %v378_v9 = vadd.f32 %v377_v62, %v376_v3 }
  0xca   : > { %v283_v2 = vpop.permute.xlu1 %282 }
  0xcb   : > { %v285_v4 = vadd.f32 %v283_v2, %v280_v58  ;;  %v294_v5 = vadd.f32 %v293_v59, %v283_v2  ;;  %v303_v6 = vadd.f32 %v302_v63, %v283_v2 }
  0xcd   : > { %286 = vst [vmem:[%s245_s12] sm:$0x1] %v285_v4  ;;  %295 = vst [vmem:[%s245_s12] sm:$0x2] %v294_v5 }
  0xce   : > { %304 = vst [vmem:[%s245_s12] sm:$0x4] %v303_v6  ;;  %v363_v10 = vpop.permute.xlu1 %362 }
  0xcf   : > { %v365_v11 = vadd.f32 %v363_v10, %v360_v7  ;;  %v372_v12 = vadd.f32 %v371_v8, %v363_v10  ;;  %v379_v13 = vadd.f32 %v378_v9, %v363_v10 }
  0xd1   : > { %366 = vst [vmem:[%s253_s15] sm:$0x1] %v365_v11  ;;  %373 = vst [vmem:[%s253_s15] sm:$0x2] %v372_v12 }
  0xd2   : > { %380 = vst [vmem:[%s253_s15] sm:$0x4] %v379_v13 }
  0xd3 PF: > { %p15_p8 = scmp.ge.s32.totalorder %s708_s20, 6   ;;  %s817_s15 = smov %s644_s16 }
  0xd4   : > { %s818_s16 = smov %s648_s17  ;;  %s819_s17 = smov %s718_s23 }
  0xd5   : > { %s820_s18 = smov %s708_s20  ;;  %17 = sbr.rel (!%p15_p8) target bundleno = 3 (0x3), region = 95 }
  0xdc   :  { %428 = vsyncpa [#allocation3], 1 }
  0xdd   :  { %430 = vsyncpa [#allocation3 + $0x1], 1 }

</bundles_post_ra>
